<compile_context>
chip_gen: v7x
topology: tpu7x:2x2x1
jax: 0.10.0
libtpu: 0.0.40
codegen_flags: <defaults>
</compile_context>

<pallas_src>
import functools

import jax
import jax.numpy as jnp
from jax.experimental import pallas as pl
from jax.experimental.pallas import tpu as pltpu

EPS = 1e-5


def _elu(y):
    # exp only sees the clamped (<=0) value -> bounded EUP work, no spurious inf.
    return jnp.where(y > 0.0, y, jnp.exp(jnp.minimum(y, 0.0)) - 1.0)


@functools.lru_cache(maxsize=None)
def _vmem_limit_bytes():
    """Generation-aware VMEM scoped limit (96 MiB on v5e/v6e, <=48 MiB on v7x)."""
    cap = 64 << 20
    try:
        cap = int(pltpu.get_tpu_info().vmem_capacity_bytes)
    except Exception:
        pass
    if cap >= (128 << 20):
        return 96 << 20
    return min((cap * 3) // 4, 48 << 20)


# ---------------------------------------------------------------------------
# Kernel 1: up_conv (ConvTranspose3d k=2,s=2) as per-voxel matmul, BN scale
# folded into the weights, shift + ELU fused in the epilogue.
# ---------------------------------------------------------------------------
def _matmul_shift_elu_kernel(a_ref, b_ref, shift_ref, o_ref):
    acc = jnp.dot(a_ref[...], b_ref[...], preferred_element_type=jnp.float32)
    o_ref[...] = _elu(acc + shift_ref[...]).astype(o_ref.dtype)


def matmul_shift_elu(a, b, shift, out_dtype=jnp.bfloat16, tm_max=1024):
    """a: (M, K) bf16, b: (K, C) bf16 (BN scale pre-folded), shift: (1, C) f32."""
    M, K = a.shape
    Kb, C = b.shape
    assert K == Kb
    if M <= tm_max:
        tm, Mp = M, M
    else:
        # prefer a divisor of M (multiple of 8) -> no HBM padding pass over `a`
        tm = 0
        for t in range(tm_max - tm_max % 8, 7, -8):
            if M % t == 0:
                tm = t
                break
        if tm:
            Mp = M
        else:
            tm = tm_max
            Mp = pl.cdiv(M, tm) * tm
    a_p = a if Mp == M else jnp.pad(a, ((0, Mp - M), (0, 0)))
    out = pl.pallas_call(
        _matmul_shift_elu_kernel,
        out_shape=jax.ShapeDtypeStruct((Mp, C), out_dtype),
        grid=(Mp // tm,),
        in_specs=[
            pl.BlockSpec((tm, K), lambda i: (i, 0)),
            pl.BlockSpec((K, C), lambda i: (0, 0)),     # weight resident (const map)
            pl.BlockSpec((1, C), lambda i: (0, 0)),
        ],
        out_specs=pl.BlockSpec((tm, C), lambda i: (i, 0)),
        compiler_params=pltpu.CompilerParams(
            dimension_semantics=("parallel",),
            vmem_limit_bytes=_vmem_limit_bytes(),
        ),
    )(a_p, b, shift)
    return out[:M] if Mp != M else out


# ---------------------------------------------------------------------------
# Kernel 2: fused LUConv  (Conv3d k=5 pad=2  ->  folded BN  ->  ELU),
# optionally also fusing the residual add + final ELU of UpTransition.
# ---------------------------------------------------------------------------
def _make_luconv_kernel(Do, Ho, Wo, Cin, Cout, with_residual):
    HW = Ho * Wo
    PR = (Ho + 4) * Wo            # rows of the packed (kw-stacked) operand
    WCin = Wo * Cin
    WPCin = (Wo + 4) * Cin

    def kernel(*refs):
        if with_residual:
            x_ref, res_ref, w_ref, shift_ref, o_ref, acc_ref, xpad_ref, pack_ref = refs
        else:
            x_ref, w_ref, shift_ref, o_ref, acc_ref, xpad_ref, pack_ref = refs
            res_ref = None

        kd = pl.program_id(2)

        @pl.when(kd == 0)
        def _init():
            acc_ref[...] = jnp.zeros_like(acc_ref)
            # Zero only the 2-wide halo border; the interior is rewritten on
            # every valid tap, so a full-plane zero would be wasted stores.
            zr = jnp.zeros((2, WPCin), jnp.bfloat16)
            xpad_ref[0:2, :] = zr
            xpad_ref[Ho + 2:Ho + 4, :] = zr
            zc = jnp.zeros((Ho, 2 * Cin), jnp.bfloat16)
            xpad_ref[2:Ho + 2, 0:2 * Cin] = zc
            xpad_ref[2:Ho + 2, WPCin - 2 * Cin:WPCin] = zc

        # Contributing input depth slice for this tap (before clipping).
        din = pl.program_id(1) + kd - 2
        valid = jnp.logical_and(din >= 0, din < Do)

        @pl.when(valid)
        def _accumulate():
            # Interior of the halo-padded plane (bf16 scratch, no casts).
            xpad_ref[2:Ho + 2, 2 * Cin:2 * Cin + WCin] = x_ref[0, 0]
            # Pack the 5 kw-shifted views along the lane axis -> K = 5*Cin.
            # pack[(hp*Wo + w), kw*Cin + ci] = xpad[hp, w + kw, ci]
            for kw in range(5):
                pack_ref[:, kw * Cin:(kw + 1) * Cin] = (
                    xpad_ref[:, kw * Cin:kw * Cin + WCin].reshape(PR, Cin))
            # 5 wide MXU matmuls (one per kh); row window of the packed operand
            # slides by Wo rows per kh.  Accumulate straight into VMEM (f32).
            for kh in range(5):
                acc_ref[...] += jnp.dot(
                    pack_ref[kh * Wo:kh * Wo + HW, :],
                    w_ref[kd * 5 + kh],
                    preferred_element_type=jnp.float32)

        @pl.when(kd == pl.num_programs(2) - 1)
        def _finalize():
            y = _elu(acc_ref[...] + shift_ref[...])      # ELU(BN(conv))
            y = y.reshape(Ho, Wo * Cout)                 # lane-dense output slab
            if with_residual:
                y = _elu(y + res_ref[0, 0].astype(jnp.float32))
            o_ref[0, 0] = y.astype(o_ref.dtype)

    return kernel


def luconv_fused(x5, w_pack, shift, res5=None, out_dtype=jnp.bfloat16):
    """x5: (N, Do, Ho, Wo, Cin); w_pack: (25, 5*Cin, Cout) bf16 with the BN
    scale folded in; shift: (1, Cout) f32; res5: optional residual tensor
    (N, Do, Ho, Wo, Cout) -> fuses `ELU(ELU(conv) + res)` for the last layer."""
    N, Do, Ho, Wo, Cin = x5.shape
    Cout = w_pack.shape[-1]
    with_res = res5 is not None
    kernel = _make_luconv_kernel(Do, Ho, Wo, Cin, Cout, with_res)

    x4 = x5.astype(jnp.bfloat16).reshape(N, Do, Ho, Wo * Cin)      # free view

    def x_map(n, d, kd):
        # clipped to a valid slice; invalid taps are masked inside the kernel
        # TODO(synk): a rolling 5-deep VMEM ring (manual DMA) would cut the 5x
        # activation re-read; kept as BlockSpec pipelining for robustness.
        dz = jnp.clip(d + kd - 2, 0, Do - 1)
        return (n, dz, 0, 0)

    in_specs = [pl.BlockSpec((1, 1, Ho, Wo * Cin), x_map)]
    inputs = [x4]
    if with_res:
        in_specs.append(pl.BlockSpec((1, 1, Ho, Wo * Cout),
                                     lambda n, d, kd: (n, d, 0, 0)))
        inputs.append(res5.astype(jnp.bfloat16).reshape(N, Do, Ho, Wo * Cout))
    in_specs += [
        # Full weight, constant index_map -> DMA'd to VMEM once per call.
        pl.BlockSpec((25, 5 * Cin, Cout), lambda n, d, kd: (0, 0, 0)),
        pl.BlockSpec((1, Cout), lambda n, d, kd: (0, 0)),
    ]
    inputs += [w_pack, shift]

    out = pl.pallas_call(
        kernel,
        out_shape=jax.ShapeDtypeStruct((N, Do, Ho, Wo * Cout), out_dtype),
        grid=(N, Do, 5),
        in_specs=in_specs,
        out_specs=pl.BlockSpec((1, 1, Ho, Wo * Cout),
                               lambda n, d, kd: (n, d, 0, 0)),
        scratch_shapes=[
            pltpu.VMEM((Ho * Wo, Cout), jnp.float32),             # f32 accumulator
            pltpu.VMEM((Ho + 4, (Wo + 4) * Cin), jnp.bfloat16),   # bf16 halo plane
            pltpu.VMEM(((Ho + 4) * Wo, 5 * Cin), jnp.bfloat16),   # packed operand
        ],
        compiler_params=pltpu.CompilerParams(
            dimension_semantics=("parallel", "parallel", "arbitrary"),
            vmem_limit_bytes=_vmem_limit_bytes(),
        ),
    )(*inputs)
    return out.reshape(N, Do, Ho, Wo, Cout)


# ---------------------------------------------------------------------------
# Parameter folding (plain JAX, done once outside the kernels)
# ---------------------------------------------------------------------------
def _fold_bn(gamma, beta, mean, var, conv_bias):
    scale = gamma / jnp.sqrt(var + EPS)
    shift = beta + (conv_bias - mean) * scale
    return scale, shift


def _prep_luconv(lc):
    """PyTorch weight (Cout, Cin, 5,5,5) -> (25(kd*5+kh), 5*Cin(kw,ci), Cout)
    bf16 with BN scale folded in; plus the f32 shift row."""
    Cout, Cin = lc['w'].shape[0], lc['w'].shape[1]
    scale, shift = _fold_bn(lc['gamma'], lc['beta'], lc['mean'], lc['var'], lc['b'])
    w = jnp.transpose(lc['w'], (2, 3, 4, 1, 0)) * scale     # (kd,kh,kw,Cin,Cout)
    w_pack = w.reshape(25, 5 * Cin, Cout).astype(jnp.bfloat16)
    return w_pack, shift[None, :].astype(jnp.float32)


# ---------------------------------------------------------------------------
# UpTransition forward
# ---------------------------------------------------------------------------
def up_transition_forward(x, skipx, params):
    """x: (N, inChans, D, H, W), skipx: (N, outChans//2, 2D, 2H, 2W) [NCDHW]."""
    N, Cin, D, H, W = x.shape
    x_cl = jnp.transpose(x, (0, 2, 3, 4, 1)).astype(jnp.bfloat16)
    skip_cl = jnp.transpose(skipx, (0, 2, 3, 4, 1)).astype(jnp.bfloat16)

    # --- up_conv (ConvTranspose3d k=2,s=2) + bn1 + relu1(ELU), scale folded ---
    Wup = params['up_w']                                   # (Cin, Chalf, 2,2,2)
    Chalf = Wup.shape[1]
    scale, shift = _fold_bn(params['bn1_gamma'], params['bn1_beta'],
                            params['bn1_mean'], params['bn1_var'], params['up_b'])
    # Spatial-major / channel-minor columns: the later interleave keeps the
    # channel axis on lanes (lane-preserving transpose).
    b = jnp.transpose(Wup * scale[None, :, None, None, None], (0, 2, 3, 4, 1))
    b = b.reshape(Cin, 8 * Chalf).astype(jnp.bfloat16)
    shift_cols = jnp.tile(shift, 8)[None, :].astype(jnp.float32)

    a = x_cl.reshape(N * D * H * W, Cin)
    up_flat = matmul_shift_elu(a, b, shift_cols, out_dtype=jnp.bfloat16)
    up = up_flat.reshape(N, D, H, W, 2, 2, 2, Chalf)
    up = jnp.transpose(up, (0, 1, 4, 2, 5, 3, 6, 7)).reshape(
        N, 2 * D, 2 * H, 2 * W, Chalf)
    # TODO(synk): the interleave + concat are still two XLA passes over the
    # upsampled tensor; they could be removed by writing `up` straight into a
    # preallocated xcat via strided output blocks / input_output_aliases.
    xcat = jnp.concatenate([up, skip_cl], axis=-1)          # bf16

    lus = params['luconvs']
    if not lus:
        # TODO(synk): nConvs == 0 corner case kept in plain JAX (ELU(xcat + xcat)).
        out_cl = _elu(xcat.astype(jnp.float32) * 2.0)
    else:
        cur = xcat
        for i, lc in enumerate(lus):
            w_pack, sh = _prep_luconv(lc)
            last = (i == len(lus) - 1)
            cur = luconv_fused(cur, w_pack, sh,
                               res5=xcat if last else None,
                               out_dtype=jnp.float32 if last else jnp.bfloat16)
        out_cl = cur

    return jnp.transpose(out_cl, (0, 4, 1, 2, 3))           # back to NCDHW (f32)


# ---------------------------------------------------------------------------
# Deterministic parameter init (shapes match the PyTorch module)
# ---------------------------------------------------------------------------
def init_params(key, in_chans, out_chans, n_convs):
    chalf = out_chans // 2
    keys = iter(jax.random.split(key, 6 + 6 * max(n_convs, 1)))
    p = {
        'up_w': 0.1 * jax.random.normal(next(keys), (in_chans, chalf, 2, 2, 2), jnp.float32),
        'up_b': 0.1 * jax.random.normal(next(keys), (chalf,), jnp.float32),
        'bn1_gamma': 1.0 + 0.1 * jax.random.normal(next(keys), (chalf,), jnp.float32),
        'bn1_beta': 0.1 * jax.random.normal(next(keys), (chalf,), jnp.float32),
        'bn1_mean': 0.1 * jax.random.normal(next(keys), (chalf,), jnp.float32),
        'bn1_var': jax.random.uniform(next(keys), (chalf,), jnp.float32, 0.5, 1.5),
    }
    lcs = []
    for _ in range(n_convs):
        lcs.append({
            'w': 0.02 * jax.random.normal(next(keys), (out_chans, out_chans, 5, 5, 5), jnp.float32),
            'b': 0.1 * jax.random.normal(next(keys), (out_chans,), jnp.float32),
            'gamma': 1.0 + 0.1 * jax.random.normal(next(keys), (out_chans,), jnp.float32),
            'beta': 0.1 * jax.random.normal(next(keys), (out_chans,), jnp.float32),
            'mean': 0.1 * jax.random.normal(next(keys), (out_chans,), jnp.float32),
            'var': jax.random.uniform(next(keys), (out_chans,), jnp.float32, 0.5, 1.5),
        })
    p['luconvs'] = lcs
    return p


# ---------------------------------------------------------------------------
# Pure-JAX reference (independent of the Pallas path) for validation
# ---------------------------------------------------------------------------
def reference_forward(x, skipx, params):
    N, Cin, D, H, W = x.shape
    x_cl = jnp.transpose(x, (0, 2, 3, 4, 1))
    skip_cl = jnp.transpose(skipx, (0, 2, 3, 4, 1))
    up = jnp.einsum('ndhwi,iopqr->ndphqwro', x_cl, params['up_w'])
    up = up.reshape(N, 2 * D, 2 * H, 2 * W, -1) + params['up_b']
    sc = params['bn1_gamma'] / jnp.sqrt(params['bn1_var'] + EPS)
    up = (up - params['bn1_mean']) * sc + params['bn1_beta']
    up = jnp.where(up > 0, up, jnp.exp(jnp.minimum(up, 0.0)) - 1.0)
    xcat = jnp.concatenate([up, skip_cl], axis=-1)
    cur = xcat
    for lc in params['luconvs']:
        wd = jnp.transpose(lc['w'], (2, 3, 4, 1, 0))       # (5,5,5,Cin,Cout)
        y = jax.lax.conv_general_dilated(
            cur, wd, window_strides=(1, 1, 1), padding=[(2, 2)] * 3,
            dimension_numbers=('NDHWC', 'DHWIO', 'NDHWC')) + lc['b']
        s = lc['gamma'] / jnp.sqrt(lc['var'] + EPS)
        y = (y - lc['mean']) * s + lc['beta']
        cur = jnp.where(y > 0, y, jnp.exp(jnp.minimum(y, 0.0)) - 1.0)
    out = cur + xcat
    out = jnp.where(out > 0, out, jnp.exp(jnp.minimum(out, 0.0)) - 1.0)
    return jnp.transpose(out, (0, 4, 1, 2, 3))


if __name__ == "__main__":
    key = jax.random.PRNGKey(0)
    kx, ks, kp = jax.random.split(key, 3)

    inChans, outChans, nConvs = 8, 8, 2
    N, D, H, W = 2, 4, 4, 4

    x = jax.random.normal(kx, (N, inChans, D, H, W), jnp.float32)
    skipx = jax.random.normal(ks, (N, outChans // 2, 2 * D, 2 * H, 2 * W), jnp.float32)
    params = init_params(kp, inChans, outChans, nConvs)

    out = jax.block_until_ready(up_transition_forward(x, skipx, params))
    assert out.shape == (N, outChans, 2 * D, 2 * H, 2 * W)

    ref = reference_forward(x, skipx, params)
    max_err = float(jnp.max(jnp.abs(out - ref)))
    # tolerance accounts for bf16 operands / bf16 inter-layer activations
    assert bool(jnp.allclose(out, ref, rtol=4e-2, atol=4e-2)), f"max err {max_err}"

    print("KERNEL_OK")
</pallas_src>

<mosaic_0001>
module attributes {stable_mosaic.version = 11 : i64} {
  func.func @_matmul_shift_elu_kernel(%arg0: i32, %arg1: memref<128x8xbf16, #tpu.memory_space<vmem>>, %arg2: memref<8x32xbf16, #tpu.memory_space<vmem>>, %arg3: memref<1x32xf32, #tpu.memory_space<vmem>>, %arg4: memref<128x32xbf16, #tpu.memory_space<vmem>>) attributes {dimension_semantics = [#tpu.dimension_semantics<parallel>], iteration_bounds = array<i64: 1>, scalar_prefetch = 0 : i64, scratch_operands = 0 : i64, tpu.core_type = #tpu.core_type<tc>, window_params = [{transform_indices = @transform_0, window_bounds = array<i64: 128, 8>}, {pipeline_mode = #tpu.pipeline_mode<synchronous>, transform_indices = @transform_1, window_bounds = array<i64: 8, 32>}, {pipeline_mode = #tpu.pipeline_mode<synchronous>, transform_indices = @transform_2, window_bounds = array<i64: 1, 32>}, {transform_indices = @transform_3, window_bounds = array<i64: 128, 32>}]} {
    %c0 = arith.constant 0 : index
    %c0_0 = arith.constant 0 : index
    %0 = vector.load %arg1[%c0, %c0_0] : memref<128x8xbf16, #tpu.memory_space<vmem>>, vector<128x8xbf16>
    %c0_1 = arith.constant 0 : index
    %c0_2 = arith.constant 0 : index
    %1 = vector.load %arg2[%c0_1, %c0_2] : memref<8x32xbf16, #tpu.memory_space<vmem>>, vector<8x32xbf16>
    %cst = arith.constant dense<0.000000e+00> : vector<128x32xf32>
    %2 = tpu.matmul %0, %1, %cst {dimension_numbers = #tpu.dot_dimension_numbers<[1], [0], [0], [1], [0, 0, 1, 1], [], []>} : vector<128x8xbf16>, vector<8x32xbf16>, vector<128x32xf32> -> vector<128x32xf32>
    %c0_3 = arith.constant 0 : index
    %c0_4 = arith.constant 0 : index
    %3 = vector.load %arg3[%c0_3, %c0_4] : memref<1x32xf32, #tpu.memory_space<vmem>>, vector<1x32xf32>
    %4 = vector.broadcast %3 : vector<1x32xf32> to vector<128x32xf32>
    %5 = arith.addf %2, %4 : vector<128x32xf32>
    %cst_5 = arith.constant 0.000000e+00 : f32
    %6 = vector.broadcast %cst_5 : f32 to vector<128x32xf32>
    %7 = arith.cmpf ogt, %5, %6 : vector<128x32xf32>
    %cst_6 = arith.constant 0.000000e+00 : f32
    %8 = vector.broadcast %cst_6 : f32 to vector<128x32xf32>
    %9 = arith.minimumf %5, %8 : vector<128x32xf32>
    %10 = math.exp %9 : vector<128x32xf32>
    %cst_7 = arith.constant 1.000000e+00 : f32
    %11 = vector.broadcast %cst_7 : f32 to vector<128x32xf32>
    %12 = arith.subf %10, %11 : vector<128x32xf32>
    %13 = arith.select %7, %5, %12 : vector<128x32xi1>, vector<128x32xf32>
    %14 = arith.truncf %13 : vector<128x32xf32> to vector<128x32xbf16>
    %c0_8 = arith.constant 0 : index
    %c0_9 = arith.constant 0 : index
    %15 = vector.load %arg4[%c0_8, %c0_9] : memref<128x32xbf16, #tpu.memory_space<vmem>>, vector<128x32xbf16>
    tpu.vector_store %arg4[%c0_8, %c0_9], %14 {strides = array<i32>} : memref<128x32xbf16, #tpu.memory_space<vmem>>, vector<128x32xbf16>,
    return
  }
  func.func @transform_0(%arg0: i32) -> (i32, i32) {
    %c0_i32 = arith.constant 0 : i32
    %c0_i32_0 = arith.constant 0 : i32
    return %arg0, %c0_i32 : i32, i32
  }
  func.func @transform_1(%arg0: i32) -> (i32, i32) {
    %c0_i32 = arith.constant 0 : i32
    %c0_i32_0 = arith.constant 0 : i32
    %c0_i32_1 = arith.constant 0 : i32
    return %c0_i32, %c0_i32_0 : i32, i32
  }
  func.func @transform_2(%arg0: i32) -> (i32, i32) {
    %c0_i32 = arith.constant 0 : i32
    %c0_i32_0 = arith.constant 0 : i32
    %c0_i32_1 = arith.constant 0 : i32
    return %c0_i32, %c0_i32_0 : i32, i32
  }
  func.func @transform_3(%arg0: i32) -> (i32, i32) {
    %c0_i32 = arith.constant 0 : i32
    %c0_i32_0 = arith.constant 0 : i32
    return %arg0, %c0_i32 : i32, i32
  }
}

</mosaic_0001>

<bundles_post_ra>
// kernel: tpu_custom_call.1
= control target key start
LH: loop header
LB: loop body
LE: loop exit
PB: predicated region body
PF: predicated region fallthrough
CT: control target
= control target key end

     0   :  { %vm104_vm0 = vcmask 1043456   ;;  %vm79_vm1 = vcmask 64512   ;;  %vm365_vm3 = vcmask 257024   ;;  %s756_s1 = inlined_call_operand.vmem [shape: bf16[8,32], index: 1, kind: input, shape index: {}]   ;;  %s757_s0 = inlined_call_operand.vmem [shape: bf16[128,8], index: 0, kind: input, shape index: {}]   ;;  %s758_s2 = inlined_call_operand.vmem [shape: f32[1,32], index: 2, kind: input, shape index: {}]   ;;  %s759_s3 = inlined_call_operand.vmem [shape: bf16[128,32], index: 3, kind: output, shape index: {}]  }
   0x1   :  { %v31_v0 = vld [vmem:[%s756_s1] sm:$0xf]  ;;  %v484_v4 = vld [vmem:[%s757_s0 + $0x8] sm:$0xff]   ;;  %v486_v6 = vld [vmem:[%s757_s0 + $0x10] sm:$0xff]  }
   0x2   :  { %480 = vmatprep.subr.msk.bf16.mxu0 %vm104_vm0, %v31_v0  ;;  %481 = vmatprep.subr.msk.bf16.mxu1 %vm104_vm0, %v31_v0  ;;  %v106_v1 = vsel %vm104_vm0, %v31_v0, 0  ;;  %v482_v2 = vld [vmem:[%s757_s0] sm:$0xff]   ;;  %v485_v5 = vld [vmem:[%s757_s0 + $0x28] sm:$0xff]   ;;  %v487_v7 = vld [vmem:[%s757_s0 + $0x30] sm:$0xff]  }
   0x3   :  { %461 = vmatpush3.bf16.msra.mxu0 %v106_v1  ;;  %479 = vmatpush3.bf16.msra.mxu1 %v106_v1  ;;  %v483_v3 = vld [vmem:[%s757_s0 + $0x20] sm:$0xff]   ;;  %v488_v8 = vld [vmem:[%s757_s0 + $0x18] sm:$0xff]  }
   0x4   :  { %462 = vmatprep.mubr.msk.bf16.mxu0 %vm79_vm1, %v482_v2  ;;  %470 = vmatprep.mubr.msk.bf16.mxu1 %vm79_vm1, %v483_v3  ;;  %v489_v9 = vld [vmem:[%s757_s0 + $0x38] sm:$0xff]   ;;  %v580_v10 = vld [vmem:[%s758_s2] ss:$0 sm:$0xff] }
   0x6   :  { %463 = vmatmul.mubr.msk.bf16.vlgmr.msra.gmra.mrb[0].mxu0 %vm79_vm1, %v484_v4  ;;  %471 = vmatmul.mubr.msk.bf16.vlgmr.msra.gmra.mrb[0].mxu1 %vm79_vm1, %v485_v5 }
   0x7   :  { %466 = vmatprep.mubr.msk.bf16.mxu0 %vm79_vm1, %v486_v6  ;;  %474 = vmatprep.mubr.msk.bf16.mxu1 %vm79_vm1, %v487_v7 }
   0xe   :  { %467 = vmatmul.mubr.msk.bf16.gmra.mrb[4].mxu0 %vm79_vm1, %v488_v8  ;;  %475 = vmatmul.mubr.msk.bf16.gmra.mrb[4].mxu1 %vm79_vm1, %v489_v9 }
  0xd9   :  { %v464_v11 = vpop.f32.mrb[0].mxu0  ;;  %v472_v13 = vpop.f32.mrb[0].mxu1 }
  0xda   :  { %v583_v12 = vadd.f32 %v464_v11, %v580_v10  ;;  %v142_v14 = vpop.f32.mrb[1].mxu0  ;;  %v586_v15 = vadd.f32 %v472_v13, %v580_v10  ;;  %v174_v17 = vpop.f32.mrb[1].mxu1 }
  0xdb   :  { %v589_v16 = vadd.f32 %v580_v10, %v142_v14  ;;  %v465_v18 = vpop.f32.mrb[2].mxu0  ;;  %v593_v20 = vadd.f32 %v580_v10, %v174_v17  ;;  %v473_v22 = vpop.f32.mrb[2].mxu1 }
  0xdc   :  { %v223_v19 = vmin.f32 %v583_v12, 0.0  ;;  %v596_v21 = vadd.f32 %v465_v18, %v580_v10  ;;  %v145_v23 = vpop.f32.mrb[3].mxu0  ;;  %v231_v24 = vmin.f32 %v586_v15, 0.0  ;;  %v177_v26 = vpop.f32.mrb[3].mxu1  ;;  %v603_v32 = vadd.f32 %v473_v22, %v580_v10 }
  0xdd   :  { %v221_v25 = vmin.f32 %v589_v16, 0.0  ;;  %v229_v28 = vmin.f32 %v593_v20, 0.0  ;;  %v606_v34 = vadd.f32 %v580_v10, %v145_v23  ;;  %v609_v35 = vadd.f32 %v580_v10, %v177_v26 }
  0xde   :  { %v241_v27 = vmul.f32 1.442695, %v223_v19  ;;  %v257_v29 = vmul.f32 1.442695, %v231_v24  ;;  %v224_v31 = vmin.f32 %v596_v21, 0.0  ;;  %v232_v37 = vmin.f32 %v603_v32, 0.0 }
  0xdf   :  { %v237_v30 = vmul.f32 1.442695, %v221_v25  ;;  %v253_v33 = vmul.f32 1.442695, %v229_v28  ;;  %v222_v39 = vmin.f32 %v606_v34, 0.0  ;;  %v230_v43 = vmin.f32 %v609_v35, 0.0 }
  0xe0   :  { %490 = vpow2.f32 %v241_v27  ;;  %v243_v36 = vmul.f32 1.442695, %v224_v31  ;;  %v259_v42 = vmul.f32 1.442695, %v232_v37  ;;  %vm207_vm2 = vcmp.gt.f32.partialorder %v583_v12, 0.0 }
  0xe1   :  { %492 = vpow2.f32 %v257_v29  ;;  %v468_v38 = vpop.f32.mrb[4].mxu0  ;;  %v476_v40 = vpop.f32.mrb[4].mxu1  ;;  %v239_v47 = vmul.f32 1.442695, %v222_v39  ;;  %v255_v52 = vmul.f32 1.442695, %v230_v43 }
  0xe2   :  { %494 = vpow2.f32 %v237_v30  ;;  %v158_v41 = vpop.f32.mrb[5].mxu0  ;;  %v615_v44 = vadd.f32 %v468_v38, %v580_v10  ;;  %v190_v45 = vpop.f32.mrb[5].mxu1  ;;  %v618_v48 = vadd.f32 %v476_v40, %v580_v10  ;;  %vm215_vm4 = vcmp.gt.f32.partialorder %v586_v15, 0.0 }
  0xe3   :  { %496 = vpow2.f32 %v253_v33  ;;  %v469_v46 = vpop.f32.mrb[6].mxu0  ;;  %v621_v49 = vadd.f32 %v580_v10, %v158_v41  ;;  %v477_v50 = vpop.f32.mrb[6].mxu1  ;;  %vm205_vm5 = vcmp.gt.f32.partialorder %v589_v16, 0.0  ;;  %v630_v58 = vadd.f32 %v580_v10, %v190_v45 }
  0xe4   :  { %498 = vpow2.f32 %v243_v36  ;;  %v161_v51 = vpop.f32.mrb[7].mxu0  ;;  %v227_v53 = vmin.f32 %v615_v44, 0.0  ;;  %v193_v54 = vpop.f32.mrb[7].mxu1  ;;  %v235_v55 = vmin.f32 %v618_v48, 0.0  ;;  %v633_v60 = vadd.f32 %v469_v46, %v580_v10 }
  0xe5   :  { %500 = vpow2.f32 %v259_v42  ;;  %v225_v57 = vmin.f32 %v621_v49, 0.0  ;;  %v636_v61 = vadd.f32 %v477_v50, %v580_v10  ;;  %v639_v62 = vadd.f32 %v580_v10, %v161_v51 }
  0xe6   :  { %502 = vpow2.f32 %v239_v47  ;;  %v249_v56 = vmul.f32 1.442695, %v227_v53  ;;  %v265_v59 = vmul.f32 1.442695, %v235_v55  ;;  %vm213_vm6 = vcmp.gt.f32.partialorder %v593_v20, 0.0 }
  0xe7   :  { %504 = vpow2.f32 %v255_v52  ;;  %v245_v63 = vmul.f32 1.442695, %v225_v57  ;;  %v233_v0 = vmin.f32 %v630_v58, 0.0  ;;  %vm208_vm7 = vcmp.gt.f32.partialorder %v596_v21, 0.0 }
  0xe8   :  { %506 = vpow2.f32 %v249_v56  ;;  %vm216_vm8 = vcmp.gt.f32.partialorder %v603_v32, 0.0  ;;  %v228_v2 = vmin.f32 %v633_v60, 0.0  ;;  %v236_v6 = vmin.f32 %v636_v61, 0.0 }
  0xe9   :  { %508 = vpow2.f32 %v265_v59  ;;  %v261_v5 = vmul.f32 1.442695, %v233_v0  ;;  %vm206_vm9 = vcmp.gt.f32.partialorder %v606_v34, 0.0  ;;  %v226_v11 = vmin.f32 %v639_v62, 0.0 }
  0xea   :  { %v491_v1 = vpop.eup %490  ;;  %510 = vpow2.f32 %v245_v63  ;;  %v251_v9 = vmul.f32 1.442695, %v228_v2  ;;  %v267_v18 = vmul.f32 1.442695, %v236_v6  ;;  %v673_v38 = vadd.f32 %v580_v10, %v193_v54 }
  0xeb   :  { %v493_v3 = vpop.eup %492  ;;  %v405_v4 = vadd.f32 -1.0, %v491_v1  ;;  %512 = vpow2.f32 %v261_v5  ;;  %v247_v31 = vmul.f32 1.442695, %v226_v11  ;;  %vm214_vm10 = vcmp.gt.f32.partialorder %v609_v35, 0.0 }
  0xec   :  { %v495_v7 = vpop.eup %494  ;;  %v413_v8 = vadd.f32 -1.0, %v493_v3  ;;  %514 = vpow2.f32 %v251_v9  ;;  %v234_v42 = vmin.f32 %v673_v38, 0.0  ;;  %vm211_vm11 = vcmp.gt.f32.partialorder %v615_v44, 0.0 }
  0xed   :  { %v497_v13 = vpop.eup %496  ;;  %v287_v14 = vsel %vm207_vm2, %v583_v12, %v405_v4  ;;  %v403_v17 = vadd.f32 -1.0, %v495_v7  ;;  %516 = vpow2.f32 %v267_v18  ;;  %vm219_vm12 = vcmp.gt.f32.partialorder %v618_v48, 0.0 }
  0xee   :  { %v499_v19 = vpop.eup %498  ;;  %v437_v22 = vpack.c.bf16 %v287_v14, %v287_v14  ;;  %v295_v23 = vsel %vm215_vm4, %v586_v15, %v413_v8  ;;  %v411_v24 = vadd.f32 -1.0, %v497_v13  ;;  %518 = vpow2.f32 %v247_v31 }
  0xef   :  { %v501_v25 = vpop.eup %500  ;;  %v445_v26 = vpack.c.bf16 %v295_v23, %v295_v23  ;;  %v285_v27 = vsel %vm205_vm5, %v589_v16, %v403_v17  ;;  %v406_v28 = vadd.f32 -1.0, %v499_v19  ;;  %v263_v51 = vmul.f32 1.442695, %v234_v42 }
  0xf0   :  { %v503_v12 = vpop.eup %502  ;;  %368 = vst.msk [vmem:[%s759_s3 + $0x8] sm:$0xf] %vm365_vm3, %v437_v22  ;;  %v435_v29 = vpack.c.bf16 %v285_v27, %v285_v27  ;;  %v293_v15 = vsel %vm213_vm6, %v593_v20, %v411_v24  ;;  %v414_v30 = vadd.f32 -1.0, %v501_v25  ;;  %vm209_vm13 = vcmp.gt.f32.partialorder %v621_v49, 0.0 }
  0xf1   :  { %v505_v33 = vpop.eup %504  ;;  %376 = vst.msk [vmem:[%s759_s3 + $0x28] sm:$0xf] %vm365_vm3, %v445_v26  ;;  %v443_v16 = vpack.c.bf16 %v293_v15, %v293_v15  ;;  %v288_v36 = vsel %vm208_vm7, %v596_v21, %v406_v28  ;;  %v404_v37 = vadd.f32 -1.0, %v503_v12  ;;  %520 = vpow2.f32 %v263_v51 }
  0xf2   :  { %366 = vst.msk [vmem:[%s759_s3] sm:$0xf] %vm365_vm3, %v435_v29  ;;  %v438_v20 = vpack.c.bf16 %v288_v36, %v288_v36  ;;  %v296_v39 = vsel %vm216_vm8, %v603_v32, %v414_v30  ;;  %v412_v40 = vadd.f32 -1.0, %v505_v33  ;;  %v507_v41 = vpop.eup %506  ;;  %vm217_vm14 = vcmp.gt.f32.partialorder %v630_v58, 0.0 }
  0xf3   :  { %374 = vst.msk [vmem:[%s759_s3 + $0x20] sm:$0xf] %vm365_vm3, %v443_v16  ;;  %v446_v10 = vpack.c.bf16 %v296_v39, %v296_v39  ;;  %v286_v21 = vsel %vm206_vm9, %v606_v34, %v404_v37  ;;  %v509_v43 = vpop.eup %508  ;;  %v409_v46 = vadd.f32 -1.0, %v507_v41  ;;  %vm212_vm15 = vcmp.gt.f32.partialorder %v633_v60, 0.0 }
  0xf4   :  { %369 = vst.msk [vmem:[%s759_s3 + $0xc] sm:$0xf] %vm365_vm3, %v438_v20  ;;  %v436_v32 = vpack.c.bf16 %v286_v21, %v286_v21  ;;  %v294_v45 = vsel %vm214_vm10, %v609_v35, %v412_v40  ;;  %v511_v47 = vpop.eup %510  ;;  %v417_v50 = vadd.f32 -1.0, %v509_v43  ;;  %vm220_vm0 = vcmp.gt.f32.partialorder %v636_v61, 0.0 }
  0xf5   :  { %377 = vst.msk [vmem:[%s759_s3 + $0x2c] sm:$0xf] %vm365_vm3, %v446_v10  ;;  %v444_v34 = vpack.c.bf16 %v294_v45, %v294_v45  ;;  %v291_v52 = vsel %vm211_vm11, %v615_v44, %v409_v46  ;;  %v407_v35 = vadd.f32 -1.0, %v511_v47  ;;  %v513_v53 = vpop.eup %512  ;;  %vm210_vm1 = vcmp.gt.f32.partialorder %v639_v62, 0.0 }
  0xf6   :  { %367 = vst.msk [vmem:[%s759_s3 + $0x4] sm:$0xf] %vm365_vm3, %v436_v32  ;;  %v441_v54 = vpack.c.bf16 %v291_v52, %v291_v52  ;;  %v299_v55 = vsel %vm219_vm12, %v618_v48, %v417_v50  ;;  %v515_v56 = vpop.eup %514  ;;  %v415_v44 = vadd.f32 -1.0, %v513_v53  ;;  %vm218_vm2 = vcmp.gt.f32.partialorder %v673_v38, 0.0 }
  0xf7   :  { %375 = vst.msk [vmem:[%s759_s3 + $0x24] sm:$0xf] %vm365_vm3, %v444_v34  ;;  %v449_v57 = vpack.c.bf16 %v299_v55, %v299_v55  ;;  %v289_v59 = vsel %vm209_vm13, %v621_v49, %v407_v35  ;;  %v517_v63 = vpop.eup %516  ;;  %v410_v1 = vadd.f32 -1.0, %v515_v56 }
  0xf8   :  { %372 = vst.msk [vmem:[%s759_s3 + $0x18] sm:$0xf] %vm365_vm3, %v441_v54  ;;  %v439_v0 = vpack.c.bf16 %v289_v59, %v289_v59  ;;  %v297_v48 = vsel %vm217_vm14, %v630_v58, %v415_v44  ;;  %v418_v49 = vadd.f32 -1.0, %v517_v63  ;;  %v519_v4 = vpop.eup %518 }
  0xf9   :  { %380 = vst.msk [vmem:[%s759_s3 + $0x38] sm:$0xf] %vm365_vm3, %v449_v57  ;;  %v447_v2 = vpack.c.bf16 %v297_v48, %v297_v48  ;;  %v292_v3 = vsel %vm212_vm15, %v633_v60, %v410_v1  ;;  %v408_v7 = vadd.f32 -1.0, %v519_v4 }
  0xfa   :  { %370 = vst.msk [vmem:[%s759_s3 + $0x10] sm:$0xf] %vm365_vm3, %v439_v0  ;;  %v442_v5 = vpack.c.bf16 %v292_v3, %v292_v3  ;;  %v300_v6 = vsel %vm220_vm0, %v636_v61, %v418_v49 }
  0xfb   :  { %378 = vst.msk [vmem:[%s759_s3 + $0x30] sm:$0xf] %vm365_vm3, %v447_v2  ;;  %v450_v58 = vpack.c.bf16 %v300_v6, %v300_v6  ;;  %v290_v60 = vsel %vm210_vm1, %v639_v62, %v408_v7  ;;  %v521_v8 = vpop.eup %520 }
  0xfc   :  { %373 = vst.msk [vmem:[%s759_s3 + $0x1c] sm:$0xf] %vm365_vm3, %v442_v5  ;;  %v440_v61 = vpack.c.bf16 %v290_v60, %v290_v60  ;;  %v416_v9 = vadd.f32 -1.0, %v521_v8 }
  0xfd   :  { %381 = vst.msk [vmem:[%s759_s3 + $0x3c] sm:$0xf] %vm365_vm3, %v450_v58 }
  0xfe   :  { %371 = vst.msk [vmem:[%s759_s3 + $0x14] sm:$0xf] %vm365_vm3, %v440_v61  ;;  %v298_v11 = vsel %vm218_vm2, %v673_v38, %v416_v9 }
  0xff   :  { %v448_v13 = vpack.c.bf16 %v298_v11, %v298_v11 }
 0x101   :  { %379 = vst.msk [vmem:[%s759_s3 + $0x34] sm:$0xf] %vm365_vm3, %v448_v13 }

</bundles_post_ra>
